<compile_context>
chip_gen: v7x
topology: tpu7x:2x2x1
jax: 0.10.0
libtpu: 0.0.40
codegen_flags: <defaults>
</compile_context>

<pallas_src>
import jax
import jax.numpy as jnp
from jax import lax
from jax.experimental import pallas as pl
from jax.experimental.pallas import tpu as pltpu

# Feature-group sizes implied by LexiconFeatures.forward:
#   afinn(1) + semeval(1) + bing_liu(1) + mpqa(4) + liwc(73) + emolex(19) = 99
FEATURE_SIZES = (1, 1, 1, 4, 73, 19)
NUM_FEATURES = sum(FEATURE_SIZES)   # 99
LANE = 128                          # lane-padded feature width on TPU


def _round_up(x, m):
    return (x + m - 1) // m * m


def build_lexicon_table(vocab_size, key):
    """Deterministic synthetic lexicon table (V, 99).

    Per-lexicon Bernoulli "coverage" masks emulate words missing from a
    lexicon (their feature block is all zeros, matching the
    `else: vector.extend([0.0]*k)` branches of the torch forward).
    """
    blocks = []
    for i, sz in enumerate(FEATURE_SIZES):
        kv, kc = jax.random.split(jax.random.fold_in(key, i))
        vals = jax.random.normal(kv, (vocab_size, sz), dtype=jnp.float32)
        covered = jax.random.bernoulli(kc, 0.7, (vocab_size, 1)).astype(jnp.float32)
        blocks.append(vals * covered)
    return jnp.concatenate(blocks, axis=1)   # (V, 99) float32


def prepare_lexicon_table(table):
    """Pad (V, D) table to (Vp, 128).  Call ONCE; hoisted out of the hot path."""
    V, D = table.shape
    Vp = _round_up(V, 8)
    return jnp.pad(table, ((0, Vp - V), (0, LANE - D)))


def lexicon_features(ids, table_p, padding_len, num_features=NUM_FEATURES,
                     tile_tokens=256):
    """out[b, s] = table[ids[b, s]] for s < min(S, padding_len), zeros otherwise."""
    B, S = ids.shape
    Vp, Dp = table_p.shape
    assert Dp == LANE

    # Token-tile size: multiple of 8 sublanes, at most `tile_tokens`.
    TS = min(_round_up(tile_tokens, 8), _round_up(padding_len, 8))
    Lp = _round_up(padding_len, TS)          # lane/sublane-aligned output length
    n_tiles = Lp // TS
    L = min(S, padding_len)                  # valid token positions (pad_sequence semantics)

    # Pad/truncate ids to (B, Lp, 1) int32 so each grid step sees a (TS, 1) column.
    ids_valid = ids[:, :min(S, Lp)].astype(jnp.int32)
    ids_p = jnp.zeros((B, Lp), jnp.int32).at[:, :ids_valid.shape[1]].set(ids_valid)
    ids_p = ids_p.reshape(B, Lp, 1)

    def kernel(ids_ref, table_ref, out_ref):
        # ids_ref:   (1, TS, 1) int32   current token tile
        # table_ref: (Vp, LANE) f32     VMEM-resident lexicon table
        # out_ref:   (1, TS, LANE) f32  dense output slab for this tile
        t = pl.program_id(1)
        ids_col = ids_ref[0]                                           # (TS, 1)
        onehot = (ids_col == lax.broadcasted_iota(jnp.int32, (TS, Vp), 1)
                  ).astype(jnp.float32)                                # (TS, Vp)
        # Exact gather via MXU: each row has exactly one 1.0 -> bit-exact lookup.
        rows = jnp.dot(onehot, table_ref[...],
                       preferred_element_type=jnp.float32)             # (TS, LANE)
        # One select per tile: zero out pad positions (s >= min(S, padding_len)).
        pos = t * TS + lax.broadcasted_iota(jnp.int32, (TS, 1), 0)
        out_ref[0] = jnp.where(pos < L, rows, 0.0)

    table_bytes = Vp * LANE * 4
    tile_bytes = TS * LANE * 4
    # Explicit VMEM budget: >= 32 MiB (v5e scoped default is 16 MiB), capped so
    # we never ask for more than v7x's 64 MiB physical VMEM.
    vmem_limit = int(min(64 * 1024 * 1024,
                         max(32 * 1024 * 1024, 2 * table_bytes + 8 * tile_bytes)))

    cost = pl.CostEstimate(
        flops=2 * B * Lp * Vp * LANE,
        transcendentals=0,
        bytes_accessed=B * Lp * 4 + table_bytes + B * Lp * LANE * 4,
    )

    out = pl.pallas_call(
        kernel,
        out_shape=jax.ShapeDtypeStruct((B, Lp, LANE), jnp.float32),
        grid=(B, n_tiles),
        in_specs=[
            pl.BlockSpec((1, TS, 1), lambda b, t: (b, t, 0)),
            # Constant block index -> table is copied to VMEM once and stays
            # resident for the whole grid.
            pl.BlockSpec((Vp, LANE), lambda b, t: (0, 0)),
        ],
        out_specs=pl.BlockSpec((1, TS, LANE), lambda b, t: (b, t, 0)),
        compiler_params=pltpu.CompilerParams(
            dimension_semantics=("parallel", "parallel"),
            vmem_limit_bytes=vmem_limit),
        cost_estimate=cost,
    )(ids_p, table_p)

    # Trailing slice back to (padding_len, 99); cheap relative to the kernel and
    # kept here to preserve the module's exact output shape.
    return out[:, :padding_len, :num_features]


def lexicon_features_ref(ids, table, padding_len):
    """Pure-JAX reference of the torch forward (lookup + pad_sequence)."""
    B, S = ids.shape
    D = table.shape[1]
    L = min(S, padding_len)
    out = jnp.zeros((B, padding_len, D), jnp.float32)
    return out.at[:, :L, :].set(table[ids[:, :L]])


if __name__ == "__main__":
    key = jax.random.PRNGKey(0)
    k_tab, k_ids = jax.random.split(key)

    V, B, S, padding_len = 64, 2, 8, 12     # small, deterministic shapes

    # TODO(synk): real lexicons are string-keyed dicts loaded from disk; here the
    # idx2word + dict lookups are replaced by a deterministic dense table.
    table = build_lexicon_table(V, k_tab)                       # (V, 99)
    table_p = prepare_lexicon_table(table)                      # (Vp, 128), built once
    ids = jax.random.randint(k_ids, (B, S), 0, V, dtype=jnp.int32)

    out = lexicon_features(ids, table_p, padding_len)
    out = jax.block_until_ready(out)

    ref = lexicon_features_ref(ids, table, padding_len)
    assert out.shape == (B, padding_len, NUM_FEATURES), out.shape
    assert out.dtype == jnp.float32
    assert jnp.allclose(out, ref, atol=1e-6), "mismatch vs pure-JAX reference"

    print("KERNEL_OK")
</pallas_src>

<mosaic_0001>
module attributes {stable_mosaic.version = 11 : i64} {
  func.func @kernel(%arg0: i32, %arg1: i32, %arg2: memref<1x16x1xi32, #tpu.memory_space<vmem>>, %arg3: memref<64x128xf32, #tpu.memory_space<vmem>>, %arg4: memref<1x16x128xf32, #tpu.memory_space<vmem>>) attributes {dimension_semantics = [#tpu.dimension_semantics<parallel>, #tpu.dimension_semantics<parallel>], iteration_bounds = array<i64: 2, 1>, scalar_prefetch = 0 : i64, scratch_operands = 0 : i64, tpu.core_type = #tpu.core_type<tc>, window_params = [{transform_indices = @transform_0, window_bounds = array<i64: 1, 16, 1>}, {pipeline_mode = #tpu.pipeline_mode<synchronous>, transform_indices = @transform_1, window_bounds = array<i64: 64, 128>}, {transform_indices = @transform_2, window_bounds = array<i64: 1, 16, 128>}]} {
    %c0 = arith.constant 0 : index
    %c0_0 = arith.constant 0 : index
    %c0_1 = arith.constant 0 : index
    %0 = vector.load %arg2[%c0, %c0_0, %c0_1] : memref<1x16x1xi32, #tpu.memory_space<vmem>>, vector<1x16x1xi32>
    %1 = vector.shape_cast %0 : vector<1x16x1xi32> to vector<16x1xi32>
    %2 = tpu.iota {dimensions = array<i32: 1>} : vector<16x64xi32>
    %3 = vector.broadcast %1 : vector<16x1xi32> to vector<16x64xi32>
    %4 = arith.cmpi eq, %3, %2 : vector<16x64xi32>
    %5 = arith.extui %4 : vector<16x64xi1> to vector<16x64xi32>
    %6 = arith.sitofp %5 : vector<16x64xi32> to vector<16x64xf32>
    %c0_2 = arith.constant 0 : index
    %c0_3 = arith.constant 0 : index
    %7 = vector.load %arg3[%c0_2, %c0_3] : memref<64x128xf32, #tpu.memory_space<vmem>>, vector<64x128xf32>
    %cst = arith.constant dense<0.000000e+00> : vector<16x128xf32>
    %8 = tpu.matmul %6, %7, %cst {dimension_numbers = #tpu.dot_dimension_numbers<[1], [0], [0], [1], [0, 0, 1, 1], [], []>} : vector<16x64xf32>, vector<64x128xf32>, vector<16x128xf32> -> vector<16x128xf32>
    %c16_i32 = arith.constant 16 : i32
    %9 = arith.muli %arg1, %c16_i32 : i32
    %10 = tpu.iota {dimensions = array<i32: 0>} : vector<16x1xi32>
    %11 = vector.broadcast %9 : i32 to vector<16x1xi32>
    %12 = arith.addi %11, %10 : vector<16x1xi32>
    %c8_i32 = arith.constant 8 : i32
    %13 = vector.broadcast %c8_i32 : i32 to vector<16x1xi32>
    %14 = arith.cmpi slt, %12, %13 : vector<16x1xi32>
    %cst_4 = arith.constant 0.000000e+00 : f32
    %15 = vector.shape_cast %14 : vector<16x1xi1> to vector<16x1xi1>
    %16 = vector.broadcast %15 : vector<16x1xi1> to vector<16x128xi1>
    %17 = vector.broadcast %cst_4 : f32 to vector<16x128xf32>
    %18 = arith.select %16, %8, %17 : vector<16x128xi1>, vector<16x128xf32>
    %c0_5 = arith.constant 0 : index
    %c0_6 = arith.constant 0 : index
    %c0_7 = arith.constant 0 : index
    %19 = vector.load %arg4[%c0_5, %c0_6, %c0_7] : memref<1x16x128xf32, #tpu.memory_space<vmem>>, vector<1x16x128xf32>
    %20 = vector.shape_cast %19 : vector<1x16x128xf32> to vector<16x128xf32>
    %21 = vector.shape_cast %18 : vector<16x128xf32> to vector<1x16x128xf32>
    tpu.vector_store %arg4[%c0_5, %c0_6, %c0_7], %21 {strides = array<i32>} : memref<1x16x128xf32, #tpu.memory_space<vmem>>, vector<1x16x128xf32>,
    return
  }
  func.func @transform_0(%arg0: i32, %arg1: i32) -> (i32, i32, i32) {
    %c0_i32 = arith.constant 0 : i32
    %c0_i32_0 = arith.constant 0 : i32
    return %arg0, %arg1, %c0_i32 : i32, i32, i32
  }
  func.func @transform_1(%arg0: i32, %arg1: i32) -> (i32, i32) {
    %c0_i32 = arith.constant 0 : i32
    %c0_i32_0 = arith.constant 0 : i32
    %c0_i32_1 = arith.constant 0 : i32
    return %c0_i32, %c0_i32_0 : i32, i32
  }
  func.func @transform_2(%arg0: i32, %arg1: i32) -> (i32, i32, i32) {
    %c0_i32 = arith.constant 0 : i32
    %c0_i32_0 = arith.constant 0 : i32
    return %arg0, %arg1, %c0_i32 : i32, i32, i32
  }
}

</mosaic_0001>

<bundles_post_ra>
// kernel: tpu_custom_call.1
= control target key start
LH: loop header
LB: loop body
LE: loop exit
PB: predicated region body
PF: predicated region fallthrough
CT: control target
= control target key end

     0   :  { %7 = vsyncpa [#allocation3], 0  ;;  %s845_s0 = inlined_call_operand.vmem [shape: s32[2,16,1], index: 0, kind: input, shape index: {}]   ;;  %s846_s1 = inlined_call_operand.hbm [shape: f32[64,128], index: 1, kind: input, shape index: {}]   ;;  %s847_s2 = inlined_call_operand.hbm [shape: f32[2,16,128], index: 2, kind: output, shape index: {}]  }
   0x1   :  { %8 = vsyncpa [#allocation4], 0 }
   0x2   :  { %10 = vsyncpa [#allocation4 + $0x1], 0  ;;  %s692_s9 = smov 0   ;;  %s694_s10 = smov 0  }
   0x3   :  { %s696_s11 = smov 0   ;;  %s698_s12 = smov 0  }
   0x4   :  { %s700_s13 = smov 0   ;;  %s702_s14 = smov 0  }
   0x5 LB: > { %s418_s15 = sadd.s32 4294967295, %s667_s14   ;;  %s419_s16 = sadd.s32 4294967294, %s667_s14   ;;  %s667_s14 = sphi %s702_s14, %s16_s14   ;;  %s663_s13 = sphi %s700_s13, %s865_s13   ;;  %s659_s12 = sphi %s698_s12, %s864_s12   ;;  %s655_s11 = sphi %s696_s11, %s863_s11   ;;  %s651_s10 = sphi %s694_s10, %s862_s10   ;;  %s647_s9 = sphi %s692_s9, %s861_s9  }
   0x6   : > { %s28_s17 = sadd.s32 1, %s663_s13  ;;  %s86_s18 = sadd.s32 1, %s655_s11 }
   0x7   : > { %p30_p0 = scmp.ge.s32.totalorder %s28_s17, 2  ;;  %p96_p1 = scmp.ne.s32.totalorder %s655_s11, %s651_s10 }
   0x8   : > { %p97_p2 = scmp.eq.s32.totalorder %s418_s15, 1  ;;  %p102_p3 = scmp.ne.s32.totalorder %s651_s10, %s647_s9 }
   0x9   : > { %s867_s17 = smov (%p30_p0, %s28_s17), 0  ;;  %p103_p5 = scmp.eq.s32.totalorder %s419_s16, 1 }
   0xa   : > { %p732_p4 = por %p97_p2, %p96_p1  ;;  %s81_s20 = ssub.s32 %s663_s13, %s867_s17 }
   0xb   : > { %p420_p6 = scmp.ge.s32.totalorder %s667_s14, 1  ;;  %p84_p7 = scmp.eq.s32.totalorder %s81_s20, 0 }
   0xc   : > { %s852_s19 = scalar_select %p732_p4, 1, 0 }
   0xd   : > { %p739_p8 = por %p103_p5, %p102_p3  ;;  %p110_p9 = scmp.lt.s32.totalorder %s667_s14, 3 }
   0xe   : > { %s745_s22 = scalar_select %p84_p7, %s655_s11, %s86_s18  }
   0xf   : > { %s853_s21 = scalar_select %p739_p8, 1, 0 }
  0x10   : > { %p747_p10 = pnand %p420_p6, %p110_p9  ;;  %p751_p11 = scmp.eq.s32.totalorder %s418_s15, 0 }
  0x11   : > { %s669_s25 = smov [#allocation2]   ;;  %s557_s30 = scalar_lea.hbm %s846_s1, 1024 }
  0x12   : > { %s854_s23 = scalar_select %p747_p10, 1, 0 }
  0x13   : > { %s855_s24 = scalar_select %p751_p11, 1, 0 }
  0x14   : > { %p490_p12 = pneg %p747_p10  ;;  %s122_s26 = sshll.u32 %s669_s25, 4  ;;  %s123_s26 = int_to_ptr.vmem [resolvable:$true] %s122_s26 }
  0x15   : > { %p558_p0 = scmp.ne.s32.totalorder %s846_s1, %s557_s30  ;;  %p564_p5 = scmp.lt.u32.totalorder %s557_s30, %s846_s1 }
  0x16   : > { %p759_p13 = pnand %p751_p11, %p490_p12 }
  0x18   : > { %p559_p1 = pneg %p759_p13 }
  0x1a   : > { %p560_p2 = pnand %p559_p1, %p558_p0 }
  0x1c   : > { %p561_p3 = pneg %p560_p2 }
  0x1e   : > { %p566_p6 = pnand %p564_p5, %p561_p3 }
  0x20   : > { %569 = shalt.err (!%p566_p6)
}
  0x21   : > { %s570_s7 = scalar_lea.vmem %s123_s26, 1024  ;;  %p578_p8 = scmp.lt.s32.totalorder %s123_s26, %s123_s26 }
  0x22   : > { %p571_p7 = scmp.ne.s32.totalorder %s123_s26, %s570_s7  ;;  %p579_p4 = scmp.lt.s32.totalorder %s570_s7, %s570_s7 }
  0x24   : > { %p573_p9 = pnand %p571_p7, %p559_p1  ;;  %p580_p11 = por %p579_p4, %p578_p8 }
  0x26   : > { %p574_p12 = pneg %p573_p9 }
  0x28   : > { %p581_p10 = pnand %p580_p11, %p574_p12 }
  0x2a   : > { %584 = shalt.err (!%p581_p10)
}
  0x2b   : > { %s670_s8 = smov 128   ;;  %s671_s15 = smov 8  }
  0x2c   : > { %493 = dma.hbm_to_vmem [thread:$0]  (!%p759_p13), %s846_s1, 1024, %s123_s26, [#allocation3], %s670_s8, %s670_s8, %s671_s15  }
  0x2d   : > { %p857_p0 = scmp.ne.s32.totalorder %s854_s23, 0 }
  0x2e   : > { %p858_p2 = scmp.ne.s32.totalorder (!%p857_p0), %s855_s24, 0 }
  0x2f   : > { %151 = sbr.rel (%p857_p0) target bundleno = 424 (0x1a8), region = 28 }
  0x36   : > { %638 = dma.done.wait (%p858_p2), [#allocation3], 1024  }
  0x37   : > { %640 = vsyncadd (%p858_p2), [#allocation3], 4294966272  ;;  %p178_p4 = scmp.lt.s32.totalorder %s659_s12, 1  ;;  %v672_v0 = vmov 0   ;;  %v204_v2 = vld [vmem:[#allocation2] sm:$0xff]  ;;  %v205_v3 = vld [vmem:[#allocation2 + $0x8] sm:$0xff]  ;;  %v190_v15 = vlaneseq }
  0x38   : > { %556 = vset.pattern.permute.xlu0 %v672_v0  ;;  %v206_v4 = vld [vmem:[#allocation2 + $0x10] sm:$0xff]  ;;  %v207_v5 = vld [vmem:[#allocation2 + $0x18] sm:$0xff]  ;;  %v468_v7 = vpack.c.bf16 %v205_v3, %v204_v2  ;;  %v208_v9 = vld [vmem:[#allocation2 + $0x20] sm:$0xff]  ;;  %vm212_vm0 = vcmask 523264   ;;  %v673_v18 = vmov 0.0   ;;  %s174_s23 = sand.u32 1, %s651_s10  }
  0x39   : > { %s179_s20 = scalar_select %p178_p4, %s659_s12, 1  ;;  %v472_v8 = vpack.c.bf16 %v207_v5, %v206_v4  ;;  %v209_v10 = vld [vmem:[#allocation2 + $0x28] sm:$0xff]  ;;  %v210_v12 = vld [vmem:[#allocation2 + $0x30] sm:$0xff]  ;;  %v211_v13 = vld [vmem:[#allocation2 + $0x38] sm:$0xff]  ;;  %v191_v16 = vand.u32 127, %v190_v15 }
  0x3a   : > { %469 = vmatprep.subr.bf16.mxu0 %v468_v7  ;;  %v476_v11 = vpack.c.bf16 %v209_v10, %v208_v9  ;;  %v480_v14 = vpack.c.bf16 %v211_v13, %v210_v12  ;;  %s425_s24 = sshll.u32 %s174_s23, 4  ;;  %s438_s3 = sshll.u32 %s659_s12, 8 }
  0x3b   : > { %s437_s25 = sshll.u32 %s179_s20, 4  ;;  %471 = vmatpush3.bf16.msra.mxu0 %v468_v7  ;;  %s176_s29 = scalar_lea.vmem [#allocation5], %s425_s24 }
  0x3c   : > { %s185_s26 = scalar_lea.vmem %s845_s0, %s437_s25  ;;  %473 = vmatprep.subr.bf16.mxu0 %v472_v8  ;;  %310 = vst [vmem:[%s176_s29 + $0x8] sm:$0xff] %v673_v18  ;;  %s327_s30 = sshll.u32 %s176_s29, 4  ;;  %s792_s30 = int_to_ptr.vmem [resolvable:$true] %s327_s30 }
  0x3d   : > { %v188_v1 = vld [vmem:[%s185_s26] sm:$0xff]  ;;  %v189_v6 = vld [vmem:[%s185_s26 + $0x8] sm:$0xff]  ;;  %s797_s6 = scalar_lea.hbm %s847_s2, %s438_s3  ;;  %s799_s7 = scalar_lea.sflag [#allocation4], %s174_s23 }
  0x3e   : > { %193 = vperm.xlu0 %556, %v188_v1   ;;  %s585_s8 = scalar_lea.vmem %s792_s30, 256  ;;  %p859_p10 = scmp.ne.s32.totalorder %s852_s19, 0 }
  0x3f   : > { %475 = vmatpush3.bf16.msra.mxu0 %v472_v8  ;;  %p586_p8 = scmp.ne.s32.totalorder %s792_s30, %s585_s8  ;;  %s674_s12 = smov [#allocation5]  }
  0x40   : > { %477 = vmatprep.subr.bf16.mxu0 %v476_v11  ;;  %s589_s15 = sshll.u32 %s674_s12, 4  ;;  %s590_s15 = int_to_ptr.vmem [resolvable:$false] %s589_s15 }
  0x41   : > { %p587_p11 = pnand %p586_p8, %p859_p10  ;;  %s591_s16 = scalar_lea.vmem %s590_s15, 512 }
  0x42   : > { %196 = vperm.xlu0 %556, %v189_v6   ;;  %p592_p1 = scmp.lt.s32.totalorder %s792_s30, %s590_s15  ;;  %p593_p3 = scmp.lt.s32.totalorder %s591_s16, %s585_s8 }
  0x43   : > { %479 = vmatpush3.bf16.msra.mxu0 %v476_v11  ;;  %p588_p13 = pneg %p587_p11 }
  0x44   : > { %481 = vmatprep.subr.bf16.mxu0 %v480_v14  ;;  %p594_p5 = por %p593_p3, %p592_p1 }
  0x46   : > { %p595_p6 = pnand %p594_p5, %p588_p13 }
  0x47   : > { %483 = vmatpush3.bf16.msra.mxu0 %v480_v14 }
  0xbd   : > { %v194_v17 = vpop.permute.xlu0 %193 }
  0xbe   : > { %vm198_vm1 = vcmp.eq.s32.totalorder %v194_v17, %v191_v16 }
  0xbf   : > { %v428_v19 = vsel %vm198_vm1, 1.0, %v673_v18 }
  0xc0   : > { %465 = vmatprep.mubr.msk.f32.mxu0 %vm212_vm0, %v428_v19 }
  0xc1   : > { %v197_v20 = vpop.permute.xlu0 %196 }
  0xc2   : > { %vm199_vm2 = vcmp.eq.s32.totalorder %v197_v20, %v191_v16 }
  0xc3   : > { %v429_v21 = vsel %vm199_vm2, 1.0, %v673_v18 }
  0xc4   : > { %466 = vmatmul.mubr.msk.f32.vlgmr.msra.gmra.mrb[0].mxu0 %vm212_vm0, %v429_v21 }
 0x197   : > { %v467_v22 = vpop.f32.mrb[0].mxu0 }
 0x198   : > { %v285_v23 = vpop.f32.mrb[1].mxu0 }
 0x199   : > { %309 = vst [vmem:[%s176_s29] sm:$0xff] %v285_v23 }
 0x19a   : > { %598 = shalt.err (!%p595_p6)
}
 0x19b   : > { %s599_s18 = scalar_lea.hbm %s797_s6, 256  ;;  %s603_s27 = scalar_lea.hbm %s847_s2, 512 }
 0x19c   : > { %p600_p7 = scmp.ne.s32.totalorder %s797_s6, %s599_s18  ;;  %p604_p0 = scmp.lt.u32.totalorder %s797_s6, %s847_s2 }
 0x19d   : > { %p605_p2 = scmp.lt.u32.totalorder %s603_s27, %s599_s18  ;;  %p607_p8 = scmp.lt.u32.totalorder %s599_s18, %s797_s6 }
 0x19e   : > { %p601_p9 = pnand %p600_p7, %p859_p10 }
 0x19f   : > { %p606_p4 = por %p605_p2, %p604_p0 }
 0x1a0   : > { %p602_p12 = pneg %p601_p9 }
 0x1a1   : > { %p608_p11 = por %p607_p8, %p606_p4 }
 0x1a3   : > { %p609_p13 = pnand %p608_p11, %p602_p12 }
 0x1a5   : > { %612 = shalt.err (!%p609_p13)
}
 0x1a6   : > { %s675_s23 = smov 128   ;;  %s676_s24 = smov 8  }
 0x1a7   : > { %488 = dma.vmem_to_hbm [thread:$0]  (%p859_p10), %s792_s30, 256, %s797_s6, %s799_s7, %s675_s23, %s675_s23, %s676_s24  }
 0x1a8 PF: > { %p500_p1 = scmp.ge.s32.totalorder %s667_s14, 2  ;;  %s342_s29 = sand.u32 1, %s647_s9  }
 0x1a9   : > { %p860_p3 = scmp.ne.s32.totalorder %s853_s21, 0  ;;  %s343_s3 = scalar_lea.sflag [#allocation4], %s342_s29 }
 0x1ab   : > { %p495_p5 = pnand %p500_p1, %p860_p3 }
 0x1ad   : > { %642 = dma.done.wait (!%p495_p5), %s343_s3, 256  }
 0x1ae   : > { %644 = vsyncadd (!%p495_p5), %s343_s3, 4294967040  ;;  %s16_s14 = sadd.s32 1, %s667_s14   ;;  %s861_s9 = smov %s651_s10 }
 0x1af   : > { %p13_p6 = scmp.ge.s32.totalorder %s16_s14, 4   ;;  %s862_s10 = smov %s655_s11 }
 0x1b0   : > { %s863_s11 = smov %s745_s22  ;;  %s864_s12 = smov %s663_s13 }
 0x1b1   : > { %s865_s13 = smov %s867_s17  ;;  %15 = sbr.rel (!%p13_p6) target bundleno = 5 (0x5), region = 68 }
 0x1b8   :  { %348 = vsyncpa [#allocation3], 1 }
 0x1b9   :  { %350 = vsyncpa [#allocation3 + $0x1], 1 }
 0x1ba   :  { %351 = vsyncpa [#allocation4], 1 }
 0x1bb   :  { %353 = vsyncpa [#allocation4 + $0x1], 1 }

</bundles_post_ra>
